<compile_context>
chip_gen: v6e
topology: v6e:2x2x1
jax: 0.10.0
libtpu: 0.0.40
codegen_flags: <defaults>
</compile_context>

<pallas_src>
import functools

import jax
import jax.numpy as jnp
from jax.experimental import pallas as pl
from jax.experimental.pallas import tpu as pltpu

_ACC_SUBLANES = 8          # f32 accumulator sublane tile
_FALLBACK_WIDTH = 512      # bulk width when #elements is not a multiple of 128
_SMEM_SPEC = pl.BlockSpec(memory_space=pltpu.MemorySpace.SMEM)


# ----------------------------------------------------------------------------
# Small static helpers
# ----------------------------------------------------------------------------
def _cdiv(a, b):
    return -(-a // b)


def _round_up(v, m):
    return ((v + m - 1) // m) * m


def _sublane_multiple(dtype):
    # Sub-32-bit dtypes pack along sublanes: bf16 -> 16-row tiles, int8 -> 32.
    return {4: 8, 2: 16, 1: 32}.get(jnp.dtype(dtype).itemsize, 8)


def _tpu_tile_config():
    """(tile_bytes, vmem_limit_bytes, reduction_core_splits) per generation."""
    kind = ""
    try:
        kind = jax.devices()[0].device_kind.lower()
    except Exception:
        pass
    if "v7" in kind or "7x" in kind:
        # 4 MiB tiles; in-flight VMEM capped well under the 32 MiB scoped
        # default (64 MiB physical per core).  2 TCs -> split the reduction.
        return 4 * 1024 * 1024, 24 * 1024 * 1024, 2
    if "v6" in kind:
        # 4 MiB tiles; in+out double-buffered ~= 16 MiB, under the 32 MiB default.
        return 4 * 1024 * 1024, 24 * 1024 * 1024, 1
    # v5e (16 MiB scoped-VMEM default) / v5p / v4 / unknown: keep 2 MiB tiles.
    return 2 * 1024 * 1024, None, 1


def _pick_tile_rows(rows, width, dtype, tile_rows, tile_bytes):
    m = _sublane_multiple(dtype)
    if tile_rows is None:
        t = max(1, tile_bytes // (width * jnp.dtype(dtype).itemsize))
    else:
        t = int(tile_rows)
    t = min(_round_up(t, m), _round_up(rows, m))
    return max(t, m)


def _as_slab(flat, n):
    """Zero-copy lane-dense (rows, width) view covering the first n_bulk elems."""
    for w in (1024, 512, 256, 128):
        if n % w == 0:
            return flat.reshape(-1, w), n
    # n is not a multiple of 128: stream the aligned bulk through the kernel
    # and leave the (< _FALLBACK_WIDTH element) tail to plain jnp.
    n_bulk = (n // _FALLBACK_WIDTH) * _FALLBACK_WIDTH
    if n_bulk == 0:
        return None, 0
    return flat[:n_bulk].reshape(-1, _FALLBACK_WIDTH), n_bulk


# ----------------------------------------------------------------------------
# Kernels
# ----------------------------------------------------------------------------
def _quant_kernel(x_ref, p_ref, o_ref):
    """Shared sym/asym fake-quant tile kernel.

    p_ref (SMEM f32[4]) = [delta, 1/delta, -zp, levels - zp]; the zero point
    is folded into the clip bounds so the per-element work is
    mul / round / clip / mul.
    """
    delta = p_ref[0]
    inv_delta = p_ref[1]
    lo = p_ref[2]
    hi = p_ref[3]
    x = x_ref[...].astype(jnp.float32)          # math in f32 regardless of I/O dtype
    xq = jnp.clip(jnp.round(x * inv_delta), lo, hi)   # jnp.round == half-to-even
    o_ref[...] = (xq * delta).astype(o_ref.dtype)


def _reduce_kernel(x_ref, sum_ref, min_ref, max_ref, *, sps, tr, valid_rows,
                   need_mask):
    """Fused sum / min / max over a row-tiled slab (one HBM pass).

    Accumulates into per-split (1, 8, width) output blocks that stay resident
    across the inner 'arbitrary' grid axis.  The expensive cross-lane reduce
    happens in the wrapper on tiny partials; per-tile work is pure VPU.
    """
    c = pl.program_id(0)
    s = pl.program_id(1)

    @pl.when(s == 0)
    def _init():
        sum_ref[...] = jnp.zeros_like(sum_ref)
        min_ref[...] = jnp.full_like(min_ref, jnp.inf)
        max_ref[...] = jnp.full_like(max_ref, -jnp.inf)

    x = x_ref[...].astype(jnp.float32)           # (tr, width)
    w = x.shape[-1]

    def _acc(xs, xmn, xmx):
        # (tr, w) -> (tr//8, 8, w): tile-aligned reshape (no relayout); the
        # axis-0 reductions are elementwise vreg adds/mins/maxes (VPU only).
        x3s = xs.reshape(tr // _ACC_SUBLANES, _ACC_SUBLANES, w)
        x3n = xmn.reshape(tr // _ACC_SUBLANES, _ACC_SUBLANES, w)
        x3x = xmx.reshape(tr // _ACC_SUBLANES, _ACC_SUBLANES, w)
        sum_ref[...] += jnp.sum(x3s, axis=0)[None]
        min_ref[...] = jnp.minimum(min_ref[...], jnp.min(x3n, axis=0)[None])
        max_ref[...] = jnp.maximum(max_ref[...], jnp.max(x3x, axis=0)[None])

    if need_mask:
        base = (c * sps + s) * tr                # logical first row of this block

        @pl.when(base + tr <= valid_rows)        # full block: no mask cost
        def _full_block():
            _acc(x, x, x)

        @pl.when(base + tr > valid_rows)         # partial / duplicate block
        def _partial_block():
            row = jax.lax.broadcasted_iota(jnp.int32, x.shape, 0) + base
            valid = row < valid_rows
            _acc(jnp.where(valid, x, 0.0),
                 jnp.where(valid, x, jnp.inf),
                 jnp.where(valid, x, -jnp.inf))
    else:
        _acc(x, x, x)


# ----------------------------------------------------------------------------
# Quantize wrappers
# ----------------------------------------------------------------------------
def _pack_params(delta, zp, levels):
    inv_delta = 1.0 / delta
    return jnp.stack([delta, inv_delta, -zp, levels - zp]).astype(jnp.float32)


def _run_quantize(x, params, tile_rows=None):
    shape, dtype = x.shape, x.dtype
    flat = jnp.ravel(x)                          # dim collapse: layout no-op
    n = flat.shape[0]
    if n == 0:
        return x
    tile_bytes, vmem_limit, _ = _tpu_tile_config()
    slab, n_bulk = _as_slab(flat, n)

    bulk_out = None
    if slab is not None:
        rows, width = slab.shape
        tr = _pick_tile_rows(rows, width, dtype, tile_rows, tile_bytes)
        bulk_out = pl.pallas_call(
            _quant_kernel,
            out_shape=jax.ShapeDtypeStruct(slab.shape, dtype),
            grid=(_cdiv(rows, tr),),
            in_specs=[pl.BlockSpec((tr, width), lambda b: (b, 0)), _SMEM_SPEC],
            out_specs=pl.BlockSpec((tr, width), lambda b: (b, 0)),
            compiler_params=pltpu.CompilerParams(
                dimension_semantics=("parallel",),
                vmem_limit_bytes=vmem_limit),
        )(slab, params)
        if n_bulk == n:
            return bulk_out.reshape(shape)

    # Tail (< 512 elements, only when n is not a multiple of 128): plain jnp.
    tail = flat[n_bulk:].astype(jnp.float32)
    tail_q = (jnp.clip(jnp.round(tail * params[1]), params[2], params[3])
              * params[0]).astype(dtype)
    if bulk_out is None:
        return tail_q.reshape(shape)
    return jnp.concatenate([bulk_out.reshape(-1), tail_q]).reshape(shape)


# ----------------------------------------------------------------------------
# Public staticmethod equivalents
# ----------------------------------------------------------------------------
def sym_quantize(x, max, bit, *, tile_rows=None):
    bit = int(bit)
    levels = float(2 ** bit - 1)
    mx = jnp.asarray(max, jnp.float32)
    # Guard the degenerate max == 0 case (reference would produce NaN).
    delta = jnp.maximum(2.0 * mx / levels, jnp.float32(1e-8))
    zp = jnp.float32(2 ** (bit - 1) - 1)
    return _run_quantize(x, _pack_params(delta, zp, levels), tile_rows)


def asym_quantize(x, max, min, bit, *, tile_rows=None):
    bit = int(bit)
    levels = float(2 ** bit - 1)
    mx = jnp.asarray(max, jnp.float32)
    mn = jnp.asarray(min, jnp.float32)
    # Guard the degenerate max == min case (reference would produce NaN).
    delta = jnp.maximum((mx - mn) / levels, jnp.float32(1e-8))
    zp = jnp.round(-mn / delta)
    return _run_quantize(x, _pack_params(delta, zp, levels), tile_rows)


def get_min_max_method(x, x_min, x_max, i, *, tile_rows=None, splits=None):
    """t == 3 branch of the reference (t is hardcoded there).

    Single fused HBM pass computes sum / min / max.  If x_min / x_max are
    None, the in-kernel min/max are used (fused calibration); otherwise the
    caller-supplied values are used, matching the reference signature.
    """
    flat = jnp.ravel(x)
    n = flat.shape[0]
    tile_bytes, vmem_limit, nsplit_cfg = _tpu_tile_config()
    nsplit = int(splits) if splits is not None else nsplit_cfg
    slab, n_bulk = _as_slab(flat, n)

    total_sum = jnp.float32(0.0)
    run_min = jnp.float32(jnp.inf)
    run_max = jnp.float32(-jnp.inf)

    if slab is not None:
        rows, width = slab.shape
        tr = _pick_tile_rows(rows, width, slab.dtype, tile_rows, tile_bytes)
        steps_total = _cdiv(rows, tr)
        nsplit = max(1, min(nsplit, steps_total))
        sps = _cdiv(steps_total, nsplit)
        last_block = steps_total - 1
        need_mask = (steps_total * tr != rows) or (nsplit * sps != steps_total)

        if nsplit * sps != steps_total:
            # Clamp duplicate trailing blocks of the last split into range;
            # their logical rows are >= rows so the in-kernel mask zeroes them.
            in_map = lambda c, s: (jnp.minimum(c * sps + s, last_block), 0)
        else:
            in_map = lambda c, s: (c * sps + s, 0)

        acc_shape = (nsplit, _ACC_SUBLANES, width)
        out_spec = pl.BlockSpec((1, _ACC_SUBLANES, width), lambda c, s: (c, 0, 0))
        sums, mins, maxs = pl.pallas_call(
            functools.partial(_reduce_kernel, sps=sps, tr=tr,
                              valid_rows=rows, need_mask=need_mask),
            out_shape=(jax.ShapeDtypeStruct(acc_shape, jnp.float32),) * 3,
            grid=(nsplit, sps),
            in_specs=[pl.BlockSpec((tr, width), in_map)],
            out_specs=(out_spec,) * 3,
            compiler_params=pltpu.CompilerParams(
                dimension_semantics=("parallel", "arbitrary"),
                vmem_limit_bytes=vmem_limit),
        )(slab)
        total_sum = jnp.sum(sums)
        run_min = jnp.min(mins)
        run_max = jnp.max(maxs)

    if n_bulk != n:                              # < 512-element remainder
        tail = flat[n_bulk:].astype(jnp.float32)
        total_sum = total_sum + jnp.sum(tail)
        run_min = jnp.minimum(run_min, jnp.min(tail))
        run_max = jnp.maximum(run_max, jnp.max(tail))

    x_mean = total_sum / jnp.float32(n)
    x_min_f = run_min if x_min is None else jnp.asarray(x_min, jnp.float32)
    x_max_f = run_max if x_max is None else jnp.asarray(x_max, jnp.float32)
    i_f = jnp.asarray(i, jnp.float32)
    new_min = x_mean - (x_mean - x_min_f) / 100.0 * i_f
    new_max = x_mean + (x_max_f - x_mean) / 100.0 * i_f
    return new_min, new_max


# ----------------------------------------------------------------------------
# Module mirror
# ----------------------------------------------------------------------------
class UniformAffineQuantizer:
    """JAX/Pallas mirror of the PyTorch module (forward is a stub, as in the spec)."""

    def __init__(self, scale_method: str = "mse", leaf_param: bool = False):
        self.scale_method = scale_method
        self.leaf_param = leaf_param
        self.n_bits = 8
        self.n_levels = 2 ** self.n_bits
        self.sym = True
        self.channel_wise = False
        self.delta_set_sym_channel = None
        self.delta_set_asym_channel = None
        self.zero_point_set_sym_channel = None
        self.zero_point_set_asym_channel = None
        self.delta_set_asym_layer = None
        self.delta_set_sym_layer = None
        self.zero_point_set_asym_layer = None
        self.zero_point_set_sym_layer = None
        self.inited = False

    def forward(self, x):
        # The reference forward() is a stub that returns None.
        return None

    __call__ = forward

    asym_quantize = staticmethod(asym_quantize)
    sym_quantize = staticmethod(sym_quantize)
    get_min_max_method = staticmethod(get_min_max_method)

    def set_quantization_bit(self, bit: int):
        assert 2 <= bit <= 8, "bitwidth not supported"
        self.n_bits = bit
        self.n_levels = 2 ** self.n_bits

    def set_quantization_params(self, bit, symmetric, channel_wise=None):
        self.n_bits = bit
        self.n_levels = 2 ** self.n_bits
        self.sym = symmetric
        self.channel_wise = channel_wise

    def update_zero_point(self):
        return


# ----------------------------------------------------------------------------
# Pure-JAX references for verification (same x*inv_delta formulation as the
# kernel; differs from x/delta only on measure-zero .5 rounding boundaries).
# ----------------------------------------------------------------------------
def _ref_sym(x, mx, bit):
    levels = 2 ** bit - 1
    delta = 2.0 * jnp.asarray(mx, jnp.float32) / levels
    zp = 2 ** (bit - 1) - 1
    xq = jnp.clip(jnp.round(x * (1.0 / delta)) + zp, 0, levels)
    return (xq - zp) * delta


def _ref_asym(x, mx, mn, bit):
    levels = 2 ** bit - 1
    delta = (jnp.asarray(mx, jnp.float32) - jnp.asarray(mn, jnp.float32)) / levels
    zp = jnp.round(-jnp.asarray(mn, jnp.float32) / delta)
    xq = jnp.clip(jnp.round(x * (1.0 / delta)) + zp, 0, levels)
    return (xq - zp) * delta


def _ref_minmax(x, x_min, x_max, i):
    x_mean = jnp.mean(x.astype(jnp.float32))
    return (x_mean - (x_mean - x_min) / 100.0 * i,
            x_mean + (x_max - x_mean) / 100.0 * i)


if __name__ == "__main__":
    key = jax.random.PRNGKey(0)
    k1, k2, k3, k4 = jax.random.split(key, 4)

    quant = UniformAffineQuantizer()
    bit = quant.n_bits
    i = 80

    # Primary example: NCHW activation (batch=2, channels=4, spatial=16x16).
    x = jax.random.normal(k1, (2, 4, 16, 16), dtype=jnp.float32)
    assert quant.forward(x) is None                      # stub forward, as in PyTorch

    x_min, x_max = jnp.min(x), jnp.max(x)
    x_absmax = jnp.max(jnp.abs(x))
    r_min, r_max = _ref_minmax(x, x_min, x_max, i)

    # Fused calibration: min / max / mean in ONE HBM pass (x_min = x_max = None).
    new_min, new_max = UniformAffineQuantizer.get_min_max_method(x, None, None, i)
    assert jnp.allclose(new_min, r_min, atol=1e-5, rtol=1e-5)
    assert jnp.allclose(new_max, r_max, atol=1e-5, rtol=1e-5)

    # API-parity path: caller-supplied x_min / x_max (reference signature).
    p_min, p_max = UniformAffineQuantizer.get_min_max_method(x, x_min, x_max, i)
    assert jnp.allclose(p_min, r_min, atol=1e-5, rtol=1e-5)
    assert jnp.allclose(p_max, r_max, atol=1e-5, rtol=1e-5)

    y_asym = UniformAffineQuantizer.asym_quantize(x, new_max, new_min, bit)
    y_sym = UniformAffineQuantizer.sym_quantize(x, x_absmax, bit)
    jax.block_until_ready((new_min, new_max, y_asym, y_sym))
    assert jnp.allclose(y_asym, _ref_asym(x, new_max, new_min, bit),
                        atol=1e-5, rtol=1e-5)
    assert jnp.allclose(y_sym, _ref_sym(x, x_absmax, bit), atol=1e-5, rtol=1e-5)
    assert y_asym.shape == x.shape and y_sym.shape == x.shape

    # Misaligned element count (1728, not a multiple of 128): bulk + jnp tail path.
    x2 = jax.random.normal(k2, (2, 3, 16, 18), dtype=jnp.float32)
    a2 = jnp.max(jnp.abs(x2))
    y2 = UniformAffineQuantizer.sym_quantize(x2, a2, bit)
    assert jnp.allclose(y2, _ref_sym(x2, a2, bit), atol=1e-5, rtol=1e-5)
    assert y2.shape == x2.shape
    m2a, m2b = UniformAffineQuantizer.get_min_max_method(x2, None, None, i)
    r2a, r2b = _ref_minmax(x2, jnp.min(x2), jnp.max(x2), i)
    assert jnp.allclose(m2a, r2a, atol=1e-5, rtol=1e-5)
    assert jnp.allclose(m2b, r2b, atol=1e-5, rtol=1e-5)

    # Multi-step grid + partial last row-block + forced 2-way core split.
    x3 = jax.random.normal(k3, (1, 5, 64, 104), dtype=jnp.float32)   # 65 slab rows
    mn3, mx3 = get_min_max_method(x3, None, None, i, tile_rows=8, splits=2)
    r_mn3, r_mx3 = _ref_minmax(x3, jnp.min(x3), jnp.max(x3), i)
    assert jnp.allclose(mn3, r_mn3, atol=1e-5, rtol=1e-5)
    assert jnp.allclose(mx3, r_mx3, atol=1e-5, rtol=1e-5)
    y3 = asym_quantize(x3, mx3, mn3, bit, tile_rows=8)
    assert jnp.allclose(y3, _ref_asym(x3, mx3, mn3, bit), atol=1e-5, rtol=1e-5)
    assert y3.shape == x3.shape

    # bf16 input (exercises dtype-aware sublane tiling; math stays f32 in-kernel).
    x_bf = x.astype(jnp.bfloat16)
    a_bf = jnp.max(jnp.abs(x_bf)).astype(jnp.float32)
    y_bf = UniformAffineQuantizer.sym_quantize(x_bf, a_bf, bit)
    assert y_bf.dtype == jnp.bfloat16 and y_bf.shape == x.shape
    assert jnp.allclose(y_bf.astype(jnp.float32),
                        _ref_sym(x_bf.astype(jnp.float32), a_bf, bit), atol=2e-2)

    # Tiny tensor (not a multiple of 128, no aligned bulk): pure-jnp fallback.
    x4 = jax.random.normal(k4, (3, 50), dtype=jnp.float32)
    a4 = jnp.max(jnp.abs(x4))
    y4 = UniformAffineQuantizer.sym_quantize(x4, a4, bit)
    assert jnp.allclose(y4, _ref_sym(x4, a4, bit), atol=1e-5, rtol=1e-5)
    m4a, m4b = UniformAffineQuantizer.get_min_max_method(x4, None, None, i)
    r4a, r4b = _ref_minmax(x4, jnp.min(x4), jnp.max(x4), i)
    assert jnp.allclose(m4a, r4a, atol=1e-5, rtol=1e-5)
    assert jnp.allclose(m4b, r4b, atol=1e-5, rtol=1e-5)

    jax.block_until_ready((y2, m2a, m2b, mn3, mx3, y3, y_bf, y4, m4a, m4b))
    print("KERNEL_OK")
</pallas_src>

<mosaic_0001>
module attributes {stable_mosaic.version = 11 : i64} {
  func.func @_reduce_kernel(%arg0: i32, %arg1: i32, %arg2: memref<8x1024xf32, #tpu.memory_space<vmem>>, %arg3: memref<1x8x1024xf32, #tpu.memory_space<vmem>>, %arg4: memref<1x8x1024xf32, #tpu.memory_space<vmem>>, %arg5: memref<1x8x1024xf32, #tpu.memory_space<vmem>>) attributes {dimension_semantics = [#tpu.dimension_semantics<parallel>, #tpu.dimension_semantics<arbitrary>], iteration_bounds = array<i64: 1, 1>, scalar_prefetch = 0 : i64, scratch_operands = 0 : i64, tpu.core_type = #tpu.core_type<tc>, window_params = [{transform_indices = @transform_0, window_bounds = array<i64: 8, 1024>}, {transform_indices = @transform_1, window_bounds = array<i64: 1, 8, 1024>}, {transform_indices = @transform_2, window_bounds = array<i64: 1, 8, 1024>}, {transform_indices = @transform_3, window_bounds = array<i64: 1, 8, 1024>}]} {
    %c0_i32 = arith.constant 0 : i32
    %0 = arith.cmpi eq, %arg1, %c0_i32 : i32
    %1 = arith.extui %0 : i1 to i32
    %c0_i32_0 = arith.constant 0 : i32
    %2 = arith.cmpi ne, %1, %c0_i32_0 : i32
    scf.if %2 {
      %cst = arith.constant 0.000000e+00 : f32
      %15 = vector.broadcast %cst : f32 to vector<1x8x1024xf32>
      %c0_7 = arith.constant 0 : index
      %c0_8 = arith.constant 0 : index
      %c0_9 = arith.constant 0 : index
      %16 = vector.load %arg3[%c0_7, %c0_8, %c0_9] : memref<1x8x1024xf32, #tpu.memory_space<vmem>>, vector<1x8x1024xf32>
      tpu.vector_store %arg3[%c0_7, %c0_8, %c0_9], %15 {strides = array<i32>} : memref<1x8x1024xf32, #tpu.memory_space<vmem>>, vector<1x8x1024xf32>,
      %cst_10 = arith.constant 0x7F800000 : f32
      %17 = vector.broadcast %cst_10 : f32 to vector<1x8x1024xf32>
      %c0_11 = arith.constant 0 : index
      %c0_12 = arith.constant 0 : index
      %c0_13 = arith.constant 0 : index
      %18 = vector.load %arg4[%c0_11, %c0_12, %c0_13] : memref<1x8x1024xf32, #tpu.memory_space<vmem>>, vector<1x8x1024xf32>
      tpu.vector_store %arg4[%c0_11, %c0_12, %c0_13], %17 {strides = array<i32>} : memref<1x8x1024xf32, #tpu.memory_space<vmem>>, vector<1x8x1024xf32>,
      %cst_14 = arith.constant 0xFF800000 : f32
      %19 = vector.broadcast %cst_14 : f32 to vector<1x8x1024xf32>
      %c0_15 = arith.constant 0 : index
      %c0_16 = arith.constant 0 : index
      %c0_17 = arith.constant 0 : index
      %20 = vector.load %arg5[%c0_15, %c0_16, %c0_17] : memref<1x8x1024xf32, #tpu.memory_space<vmem>>, vector<1x8x1024xf32>
      tpu.vector_store %arg5[%c0_15, %c0_16, %c0_17], %19 {strides = array<i32>} : memref<1x8x1024xf32, #tpu.memory_space<vmem>>, vector<1x8x1024xf32>,
    } else {
    }
    %c0 = arith.constant 0 : index
    %c0_1 = arith.constant 0 : index
    %3 = vector.load %arg2[%c0, %c0_1] : memref<8x1024xf32, #tpu.memory_space<vmem>>, vector<8x1024xf32>
    %c1_i32 = arith.constant 1 : i32
    %4 = arith.muli %arg0, %c1_i32 : i32
    %5 = arith.addi %4, %arg1 : i32
    %c8_i32 = arith.constant 8 : i32
    %6 = arith.muli %5, %c8_i32 : i32
    %c8_i32_2 = arith.constant 8 : i32
    %7 = arith.addi %6, %c8_i32_2 : i32
    %c2_i32 = arith.constant 2 : i32
    %8 = arith.cmpi sle, %7, %c2_i32 : i32
    %9 = arith.extui %8 : i1 to i32
    %c0_i32_3 = arith.constant 0 : i32
    %10 = arith.cmpi ne, %9, %c0_i32_3 : i32
    scf.if %10 {
      %15 = vector.shape_cast %3 : vector<8x1024xf32> to vector<1x8x1024xf32>
      %16 = vector.shape_cast %3 : vector<8x1024xf32> to vector<1x8x1024xf32>
      %17 = vector.shape_cast %3 : vector<8x1024xf32> to vector<1x8x1024xf32>
      %c0_7 = arith.constant 0 : index
      %c0_8 = arith.constant 0 : index
      %c0_9 = arith.constant 0 : index
      %18 = vector.load %arg3[%c0_7, %c0_8, %c0_9] : memref<1x8x1024xf32, #tpu.memory_space<vmem>>, vector<1x8x1024xf32>
      %cst = arith.constant dense<0.000000e+00> : vector<8x1024xf32>
      %19 = vector.multi_reduction <add>, %15, %cst [0] : vector<1x8x1024xf32> to vector<8x1024xf32>
      %20 = vector.shape_cast %19 : vector<8x1024xf32> to vector<1x8x1024xf32>
      %21 = arith.addf %18, %20 : vector<1x8x1024xf32>
      %c0_10 = arith.constant 0 : index
      %c0_11 = arith.constant 0 : index
      %c0_12 = arith.constant 0 : index
      %22 = vector.load %arg3[%c0_10, %c0_11, %c0_12] : memref<1x8x1024xf32, #tpu.memory_space<vmem>>, vector<1x8x1024xf32>
      tpu.vector_store %arg3[%c0_10, %c0_11, %c0_12], %21 {strides = array<i32>} : memref<1x8x1024xf32, #tpu.memory_space<vmem>>, vector<1x8x1024xf32>,
      %c0_13 = arith.constant 0 : index
      %c0_14 = arith.constant 0 : index
      %c0_15 = arith.constant 0 : index
      %23 = vector.load %arg4[%c0_13, %c0_14, %c0_15] : memref<1x8x1024xf32, #tpu.memory_space<vmem>>, vector<1x8x1024xf32>
      %cst_16 = arith.constant dense<0x7F800000> : vector<8x1024xf32>
      %24 = vector.multi_reduction <minimumf>, %16, %cst_16 [0] : vector<1x8x1024xf32> to vector<8x1024xf32>
      %25 = vector.shape_cast %24 : vector<8x1024xf32> to vector<1x8x1024xf32>
      %26 = arith.minimumf %23, %25 : vector<1x8x1024xf32>
      %c0_17 = arith.constant 0 : index
      %c0_18 = arith.constant 0 : index
      %c0_19 = arith.constant 0 : index
      %27 = vector.load %arg4[%c0_17, %c0_18, %c0_19] : memref<1x8x1024xf32, #tpu.memory_space<vmem>>, vector<1x8x1024xf32>
      tpu.vector_store %arg4[%c0_17, %c0_18, %c0_19], %26 {strides = array<i32>} : memref<1x8x1024xf32, #tpu.memory_space<vmem>>, vector<1x8x1024xf32>,
      %c0_20 = arith.constant 0 : index
      %c0_21 = arith.constant 0 : index
      %c0_22 = arith.constant 0 : index
      %28 = vector.load %arg5[%c0_20, %c0_21, %c0_22] : memref<1x8x1024xf32, #tpu.memory_space<vmem>>, vector<1x8x1024xf32>
      %cst_23 = arith.constant dense<0xFF800000> : vector<8x1024xf32>
      %29 = vector.multi_reduction <maximumf>, %17, %cst_23 [0] : vector<1x8x1024xf32> to vector<8x1024xf32>
      %30 = vector.shape_cast %29 : vector<8x1024xf32> to vector<1x8x1024xf32>
      %31 = arith.maximumf %28, %30 : vector<1x8x1024xf32>
      %c0_24 = arith.constant 0 : index
      %c0_25 = arith.constant 0 : index
      %c0_26 = arith.constant 0 : index
      %32 = vector.load %arg5[%c0_24, %c0_25, %c0_26] : memref<1x8x1024xf32, #tpu.memory_space<vmem>>, vector<1x8x1024xf32>
      tpu.vector_store %arg5[%c0_24, %c0_25, %c0_26], %31 {strides = array<i32>} : memref<1x8x1024xf32, #tpu.memory_space<vmem>>, vector<1x8x1024xf32>,
    } else {
    }
    %c8_i32_4 = arith.constant 8 : i32
    %11 = arith.addi %6, %c8_i32_4 : i32
    %c2_i32_5 = arith.constant 2 : i32
    %12 = arith.cmpi sgt, %11, %c2_i32_5 : i32
    %13 = arith.extui %12 : i1 to i32
    %c0_i32_6 = arith.constant 0 : i32
    %14 = arith.cmpi ne, %13, %c0_i32_6 : i32
    scf.if %14 {
      %15 = tpu.iota {dimensions = array<i32: 0>} : vector<8x1024xi32>
      %16 = vector.broadcast %6 : i32 to vector<8x1024xi32>
      %17 = arith.addi %15, %16 : vector<8x1024xi32>
      %c2_i32_7 = arith.constant 2 : i32
      %18 = vector.broadcast %c2_i32_7 : i32 to vector<8x1024xi32>
      %19 = arith.cmpi slt, %17, %18 : vector<8x1024xi32>
      %cst = arith.constant 0.000000e+00 : f32
      %20 = vector.broadcast %cst : f32 to vector<8x1024xf32>
      %21 = arith.select %19, %3, %20 : vector<8x1024xi1>, vector<8x1024xf32>
      %cst_8 = arith.constant 0x7F800000 : f32
      %22 = vector.broadcast %cst_8 : f32 to vector<8x1024xf32>
      %23 = arith.select %19, %3, %22 : vector<8x1024xi1>, vector<8x1024xf32>
      %cst_9 = arith.constant 0xFF800000 : f32
      %24 = vector.broadcast %cst_9 : f32 to vector<8x1024xf32>
      %25 = arith.select %19, %3, %24 : vector<8x1024xi1>, vector<8x1024xf32>
      %26 = vector.shape_cast %21 : vector<8x1024xf32> to vector<1x8x1024xf32>
      %27 = vector.shape_cast %23 : vector<8x1024xf32> to vector<1x8x1024xf32>
      %28 = vector.shape_cast %25 : vector<8x1024xf32> to vector<1x8x1024xf32>
      %c0_10 = arith.constant 0 : index
      %c0_11 = arith.constant 0 : index
      %c0_12 = arith.constant 0 : index
      %29 = vector.load %arg3[%c0_10, %c0_11, %c0_12] : memref<1x8x1024xf32, #tpu.memory_space<vmem>>, vector<1x8x1024xf32>
      %cst_13 = arith.constant dense<0.000000e+00> : vector<8x1024xf32>
      %30 = vector.multi_reduction <add>, %26, %cst_13 [0] : vector<1x8x1024xf32> to vector<8x1024xf32>
      %31 = vector.shape_cast %30 : vector<8x1024xf32> to vector<1x8x1024xf32>
      %32 = arith.addf %29, %31 : vector<1x8x1024xf32>
      %c0_14 = arith.constant 0 : index
      %c0_15 = arith.constant 0 : index
      %c0_16 = arith.constant 0 : index
      %33 = vector.load %arg3[%c0_14, %c0_15, %c0_16] : memref<1x8x1024xf32, #tpu.memory_space<vmem>>, vector<1x8x1024xf32>
      tpu.vector_store %arg3[%c0_14, %c0_15, %c0_16], %32 {strides = array<i32>} : memref<1x8x1024xf32, #tpu.memory_space<vmem>>, vector<1x8x1024xf32>,
      %c0_17 = arith.constant 0 : index
      %c0_18 = arith.constant 0 : index
      %c0_19 = arith.constant 0 : index
      %34 = vector.load %arg4[%c0_17, %c0_18, %c0_19] : memref<1x8x1024xf32, #tpu.memory_space<vmem>>, vector<1x8x1024xf32>
      %cst_20 = arith.constant dense<0x7F800000> : vector<8x1024xf32>
      %35 = vector.multi_reduction <minimumf>, %27, %cst_20 [0] : vector<1x8x1024xf32> to vector<8x1024xf32>
      %36 = vector.shape_cast %35 : vector<8x1024xf32> to vector<1x8x1024xf32>
      %37 = arith.minimumf %34, %36 : vector<1x8x1024xf32>
      %c0_21 = arith.constant 0 : index
      %c0_22 = arith.constant 0 : index
      %c0_23 = arith.constant 0 : index
      %38 = vector.load %arg4[%c0_21, %c0_22, %c0_23] : memref<1x8x1024xf32, #tpu.memory_space<vmem>>, vector<1x8x1024xf32>
      tpu.vector_store %arg4[%c0_21, %c0_22, %c0_23], %37 {strides = array<i32>} : memref<1x8x1024xf32, #tpu.memory_space<vmem>>, vector<1x8x1024xf32>,
      %c0_24 = arith.constant 0 : index
      %c0_25 = arith.constant 0 : index
      %c0_26 = arith.constant 0 : index
      %39 = vector.load %arg5[%c0_24, %c0_25, %c0_26] : memref<1x8x1024xf32, #tpu.memory_space<vmem>>, vector<1x8x1024xf32>
      %cst_27 = arith.constant dense<0xFF800000> : vector<8x1024xf32>
      %40 = vector.multi_reduction <maximumf>, %28, %cst_27 [0] : vector<1x8x1024xf32> to vector<8x1024xf32>
      %41 = vector.shape_cast %40 : vector<8x1024xf32> to vector<1x8x1024xf32>
      %42 = arith.maximumf %39, %41 : vector<1x8x1024xf32>
      %c0_28 = arith.constant 0 : index
      %c0_29 = arith.constant 0 : index
      %c0_30 = arith.constant 0 : index
      %43 = vector.load %arg5[%c0_28, %c0_29, %c0_30] : memref<1x8x1024xf32, #tpu.memory_space<vmem>>, vector<1x8x1024xf32>
      tpu.vector_store %arg5[%c0_28, %c0_29, %c0_30], %42 {strides = array<i32>} : memref<1x8x1024xf32, #tpu.memory_space<vmem>>, vector<1x8x1024xf32>,
    } else {
    }
    return
  }
  func.func @transform_0(%arg0: i32, %arg1: i32) -> (i32, i32) {
    %c1_i32 = arith.constant 1 : i32
    %0 = arith.muli %arg0, %c1_i32 : i32
    %1 = arith.addi %0, %arg1 : i32
    %c0_i32 = arith.constant 0 : i32
    %c0_i32_0 = arith.constant 0 : i32
    return %1, %c0_i32 : i32, i32
  }
  func.func @transform_1(%arg0: i32, %arg1: i32) -> (i32, i32, i32) {
    %c0_i32 = arith.constant 0 : i32
    %c0_i32_0 = arith.constant 0 : i32
    %c0_i32_1 = arith.constant 0 : i32
    return %arg0, %c0_i32, %c0_i32_0 : i32, i32, i32
  }
  func.func @transform_2(%arg0: i32, %arg1: i32) -> (i32, i32, i32) {
    %c0_i32 = arith.constant 0 : i32
    %c0_i32_0 = arith.constant 0 : i32
    %c0_i32_1 = arith.constant 0 : i32
    return %arg0, %c0_i32, %c0_i32_0 : i32, i32, i32
  }
  func.func @transform_3(%arg0: i32, %arg1: i32) -> (i32, i32, i32) {
    %c0_i32 = arith.constant 0 : i32
    %c0_i32_0 = arith.constant 0 : i32
    %c0_i32_1 = arith.constant 0 : i32
    return %arg0, %c0_i32, %c0_i32_0 : i32, i32, i32
  }
}

</mosaic_0001>

<bundles_post_ra>
// kernel: tpu_custom_call.1
= control target key start
LH: loop header
LB: loop body
LE: loop exit
PB: predicated region body
PF: predicated region fallthrough
CT: control target
= control target key end

     0   :  { %9 = vsyncpa [#allocation3], 0  ;;  %s790_s0 = inlined_call_operand.hbm [shape: f32[2,1024], index: 0, kind: input, shape index: {}]   ;;  %s791_s1 = inlined_call_operand.hbm [shape: f32[1,8,1024], index: 1, kind: output, shape index: {0}]   ;;  %s792_s2 = inlined_call_operand.hbm [shape: f32[1,8,1024], index: 2, kind: output, shape index: {1}]   ;;  %s793_s3 = inlined_call_operand.hbm [shape: f32[1,8,1024], index: 3, kind: output, shape index: {2}]  }
   0x1   :  { %10 = vsyncpa [#allocation4], 0 }
   0x2   :  { %11 = vsyncpa [#allocation7], 0 }
   0x3   :  { %21 = vsyncadd [#allocation3], 768  ;;  %s692_s12 = smov [#allocation2]  }
   0x4   :  { %s27_s13 = sshll.u32 %s692_s12, 4  ;;  %s28_s13 = int_to_ptr.vmem [resolvable:$true] %s27_s13 }
   0x5   :  { %s614_s14 = scalar_lea.vmem %s28_s13, 256  ;;  %s618_s15 = scalar_lea.vmem %s28_s13, 1024 }
   0x6   :  { %p615_p0 = scmp.ne.s32.totalorder %s28_s13, %s614_s14  ;;  %p619_p1 = scmp.lt.s32.totalorder %s28_s13, %s28_s13 }
   0x7   :  { %p620_p2 = scmp.lt.s32.totalorder %s618_s15, %s614_s14 }
   0x9   :  { %p621_p3 = por %p620_p2, %p619_p1 }
   0xb   :  { %p622_p4 = pnand %p621_p3, %p615_p0 }
   0xd   :  { %625 = shalt.err (!%p622_p4)
}
   0xe   :  { %s693_s16 = smov 256   ;;  %s694_s17 = smov 16  }
   0xf   :  { %33 = dma.hbm_to_vmem [thread:$0]  %s790_s0, 256, %s28_s13, [#allocation3], %s693_s16, %s693_s16, %s694_s17  }
  0x10   :  { %686 = dma.done.wait [#allocation3], 1024  }
  0x11   :  { %687 = vsyncadd [#allocation3], 4294966272  ;;  %v345_v0 = vlaneseq  ;;  %v695_v2 = vmov 1983009808   ;;  %v594_v6 = vld [vmem:[#allocation2] ss:$16 sps:$4 sm:$0xff]  }
  0x12   :  { %v363_v3 = vunpack.c.l.s4 %v695_v2  ;;  %v596_v7 = vld [vmem:[#allocation2 + $0x20] ss:$16 sps:$4 sm:$0xff]   ;;  %v598_v8 = vld [vmem:[#allocation2 + $0x4] ss:$16 sps:$4 sm:$0xff]   ;;  %v600_v14 = vld [vmem:[#allocation2 + $0x8] ss:$16 sps:$4 sm:$0xff]  }
  0x13   :  { %v722_v1 = vshrl.u32 %v345_v0, 7  ;;  %v599_v9 = vld [vmem:[#allocation2 + $0x24] ss:$16 sps:$4 sm:$0xff]   ;;  %v602_v15 = vld [vmem:[#allocation2 + $0x28] ss:$16 sps:$4 sm:$0xff]   ;;  %s696_s0 = smov [#allocation6]  }
  0x14   :  { %v364_v4 = vunpack.c.0.s8 %v363_v3  ;;  %v604_v16 = vld [vmem:[#allocation2 + $0xc] ss:$16 sps:$4 sm:$0xff]   ;;  %s558_s20 = sshll.u32 %s696_s0, 4  ;;  %s697_s21 = smov [#allocation5]   ;;  %s559_s20 = int_to_ptr.vmem [resolvable:$true] %s558_s20 }
  0x15   :  { %vm349_vm0 = vcmp.lt.s32.totalorder %v722_v1, 2  ;;  %v605_v19 = vld [vmem:[#allocation2 + $0x2c] ss:$16 sps:$4 sm:$0xff]   ;;  %s548_s22 = sshll.u32 %s697_s21, 4  ;;  %s626_s23 = scalar_lea.vmem %s559_s20, 1024  ;;  %s758_s22 = int_to_ptr.vmem [resolvable:$true] %s548_s22 }
  0x16   :  { %v367_v5 = vsub.s32 %v364_v4, %v722_v1  ;;  %p627_p5 = scmp.ne.s32.totalorder %s559_s20, %s626_s23  ;;  %p631_p6 = scmp.lt.s32.totalorder %s559_s20, %s559_s20 }
  0x17   :  { %p632_p7 = scmp.lt.s32.totalorder %s626_s23, %s626_s23 }
  0x18   :  { %v368_v10 = vrot.slane %v594_v6, %v367_v5  ;;  %v382_v11 = vrot.slane %v596_v7, %v367_v5  ;;  %v375_v12 = vrot.slane %v598_v8, %v367_v5  ;;  %v389_v13 = vrot.slane %v599_v9, %v367_v5 }
  0x19   :  { %v404_v22 = vrot.slane %v600_v14, %v367_v5  ;;  %v418_v23 = vrot.slane %v602_v15, %v367_v5  ;;  %v411_v26 = vrot.slane %v604_v16, %v367_v5  ;;  %v425_v27 = vrot.slane %v605_v19, %v367_v5  ;;  %p633_p8 = por %p632_p7, %p631_p6 }
  0x1a   :  { %v390_v17 = vcombine.low %v368_v10, %v382_v11  ;;  %v391_v18 = vcombine.high %v368_v10, %v382_v11  ;;  %v392_v20 = vcombine.low %v375_v12, %v389_v13  ;;  %v393_v21 = vcombine.high %v375_v12, %v389_v13 }
  0x1b   :  { %v426_v30 = vcombine.low %v404_v22, %v418_v23  ;;  %v427_v31 = vcombine.high %v404_v22, %v418_v23  ;;  %v428_v32 = vcombine.low %v411_v26, %v425_v27  ;;  %v429_v33 = vcombine.high %v411_v26, %v425_v27  ;;  %p634_p9 = pnand %p633_p8, %p627_p5 }
  0x1c   :  { %v446_v24 = vsel %vm349_vm0, %v390_v17, inf  ;;  %v447_v25 = vsel %vm349_vm0, %v391_v18, inf  ;;  %v448_v28 = vsel %vm349_vm0, %v392_v20, inf  ;;  %v449_v29 = vsel %vm349_vm0, %v393_v21, inf }
  0x1d   :  { %510 = vst [vmem:[#allocation6] sm:$0xff] %v446_v24  ;;  %511 = vst [vmem:[#allocation6 + $0x8] sm:$0xff] %v447_v25  ;;  %v438_v34 = vsel %vm349_vm0, %v390_v17, 0.0  ;;  %v439_v35 = vsel %vm349_vm0, %v391_v18, 0.0  ;;  %v450_v36 = vsel %vm349_vm0, %v426_v30, inf  ;;  %v451_v37 = vsel %vm349_vm0, %v427_v31, inf }
  0x1e   :  { %512 = vst [vmem:[#allocation6 + $0x10] sm:$0xff] %v448_v28  ;;  %513 = vst [vmem:[#allocation6 + $0x18] sm:$0xff] %v449_v29  ;;  %v452_v38 = vsel %vm349_vm0, %v428_v32, inf  ;;  %v453_v39 = vsel %vm349_vm0, %v429_v33, inf  ;;  %v440_v40 = vsel %vm349_vm0, %v392_v20, 0.0  ;;  %v441_v41 = vsel %vm349_vm0, %v393_v21, 0.0 }
  0x1f   :  { %486 = vst [vmem:[#allocation5] sm:$0xff] %v438_v34  ;;  %487 = vst [vmem:[#allocation5 + $0x8] sm:$0xff] %v439_v35  ;;  %v442_v42 = vsel %vm349_vm0, %v426_v30, 0.0  ;;  %v443_v43 = vsel %vm349_vm0, %v427_v31, 0.0  ;;  %v444_v44 = vsel %vm349_vm0, %v428_v32, 0.0  ;;  %v445_v45 = vsel %vm349_vm0, %v429_v33, 0.0 }
  0x20   :  { %514 = vst [vmem:[#allocation6 + $0x20] sm:$0xff] %v450_v36  ;;  %515 = vst [vmem:[#allocation6 + $0x28] sm:$0xff] %v451_v37  ;;  %v454_v46 = vsel %vm349_vm0, %v390_v17, -inf  ;;  %v455_v47 = vsel %vm349_vm0, %v391_v18, -inf }
  0x21   :  { %516 = vst [vmem:[#allocation6 + $0x30] sm:$0xff] %v452_v38  ;;  %517 = vst [vmem:[#allocation6 + $0x38] sm:$0xff] %v453_v39 }
  0x22   :  { %488 = vst [vmem:[#allocation5 + $0x10] sm:$0xff] %v440_v40  ;;  %489 = vst [vmem:[#allocation5 + $0x18] sm:$0xff] %v441_v41 }
  0x23   :  { %637 = shalt.err (!%p634_p9)
}
  0x24   :  { %561 = dma.vmem_to_hbm [thread:$0]  %s559_s20, 1024, %s792_s2, [#allocation7]   ;;  %490 = vst [vmem:[#allocation5 + $0x20] sm:$0xff] %v442_v42  ;;  %491 = vst [vmem:[#allocation5 + $0x28] sm:$0xff] %v443_v43  ;;  %v456_v48 = vsel %vm349_vm0, %v392_v20, -inf  ;;  %v457_v49 = vsel %vm349_vm0, %v393_v21, -inf }
  0x25   :  { %s698_s26 = smov [#allocation8]   ;;  %492 = vst [vmem:[#allocation5 + $0x30] sm:$0xff] %v444_v44  ;;  %493 = vst [vmem:[#allocation5 + $0x38] sm:$0xff] %v445_v45  ;;  %v458_v50 = vsel %vm349_vm0, %v426_v30, -inf  ;;  %v459_v51 = vsel %vm349_vm0, %v427_v31, -inf  ;;  %v460_v52 = vsel %vm349_vm0, %v428_v32, -inf  ;;  %p651_p11 = scmp.lt.s32.totalorder %s758_s22, %s758_s22 }
  0x26   :  { %s568_s27 = sshll.u32 %s698_s26, 4  ;;  %534 = vst [vmem:[#allocation8] sm:$0xff] %v454_v46  ;;  %535 = vst [vmem:[#allocation8 + $0x8] sm:$0xff] %v455_v47  ;;  %v461_v53 = vsel %vm349_vm0, %v429_v33, -inf  ;;  %s646_s2 = scalar_lea.vmem %s758_s22, 1024  ;;  %s569_s27 = int_to_ptr.vmem [resolvable:$true] %s568_s27 }
  0x27   :  { %p647_p10 = scmp.ne.s32.totalorder %s758_s22, %s646_s2  ;;  %p652_p12 = scmp.lt.s32.totalorder %s646_s2, %s646_s2 }
  0x29   :  { %p653_p13 = por %p652_p12, %p651_p11 }
  0x2b   :  { %p654_p0 = pnand %p653_p13, %p647_p10 }
  0x2d   :  { %657 = shalt.err (!%p654_p0)
}
  0x2e   :  { %551 = dma.vmem_to_hbm [thread:$0]  %s758_s22, 1024, %s791_s1, [#allocation4]   ;;  %536 = vst [vmem:[#allocation8 + $0x10] sm:$0xff] %v456_v48  ;;  %537 = vst [vmem:[#allocation8 + $0x18] sm:$0xff] %v457_v49 }
  0x2f   :  { %538 = vst [vmem:[#allocation8 + $0x20] sm:$0xff] %v458_v50  ;;  %539 = vst [vmem:[#allocation8 + $0x28] sm:$0xff] %v459_v51  ;;  %s666_s30 = scalar_lea.vmem %s569_s27, 1024  ;;  %p671_p2 = scmp.lt.s32.totalorder %s569_s27, %s569_s27 }
  0x30   :  { %540 = vst [vmem:[#allocation8 + $0x30] sm:$0xff] %v460_v52  ;;  %541 = vst [vmem:[#allocation8 + $0x38] sm:$0xff] %v461_v53  ;;  %p667_p1 = scmp.ne.s32.totalorder %s569_s27, %s666_s30  ;;  %p672_p3 = scmp.lt.s32.totalorder %s666_s30, %s666_s30 }
  0x32   :  { %p673_p4 = por %p672_p3, %p671_p2 }
  0x34   :  { %p674_p5 = pnand %p673_p4, %p667_p1 }
  0x36   :  { %677 = shalt.err (!%p674_p5)
}
  0x37   :  { %571 = dma.vmem_to_hbm [thread:$0]  %s569_s27, 1024, %s793_s3, [#allocation7]  }
  0x38   :  { %688 = dma.done.wait [#allocation4], 1024  }
  0x39   :  { %689 = vsyncadd [#allocation4], 4294966272 }
  0x3a   :  { %690 = dma.done.wait [#allocation7], 2048  }
  0x3b   :  { %691 = vsyncadd [#allocation7], 4294965248 }
  0x3c   :  { %581 = vsyncpa [#allocation3], 1 }
  0x3d   :  { %582 = vsyncpa [#allocation4], 1 }
  0x3e   :  { %583 = vsyncpa [#allocation7], 1 }

</bundles_post_ra>
